<compile_context>
chip_gen: v7x
topology: tpu7x:2x2x1
jax: 0.10.0
libtpu: 0.0.40
codegen_flags: <defaults>
</compile_context>

<pallas_src>
import functools

import jax
import jax.numpy as jnp
from jax.experimental import pallas as pl
from jax.experimental.pallas import tpu as pltpu

_VALID_ACTIVATIONS = ("relu", "sigmoid", "tanh", None)


# ----------------------------------------------------------------------------
# Pallas kernel: fused 2-layer MLP head
# ----------------------------------------------------------------------------
def _regression_head_kernel(x_ref, w1_ref, b1_ref, w2_ref, b2_ref, o_ref, *,
                            activation):
    # Layer 1: x @ W1 + b1, ReLU.  MXU matmul with f32 accumulation.
    h = jnp.dot(x_ref[...], w1_ref[...],
                preferred_element_type=jnp.float32) + b1_ref[...]
    h = jnp.maximum(h, 0.0)
    # Layer 2: h @ W2 + b2 (same kernel -> hidden stays in vregs/VMEM).
    y = jnp.dot(h, w2_ref[...],
                preferred_element_type=jnp.float32) + b2_ref[...]
    # Output activation (static Python branch -> specialized at trace time).
    if activation == "relu":
        y = jnp.maximum(y, 0.0)
    elif activation == "sigmoid":
        y = jax.nn.sigmoid(y)
    elif activation == "tanh":
        y = jnp.tanh(y)
    # activation is None -> identity.
    o_ref[...] = y.astype(o_ref.dtype)


def regression_head_pallas(x, w1, b1, w2, b2, *, activation=None, tile_r=512):
    """Fused RegressionHead forward.

    x:  (R, Din) f32
    w1: (Din, H) f32, b1: (1, H) f32     (torch Linear weight stored transposed: x @ W)
    w2: (H, Dout) f32, b2: (1, Dout) f32
    returns (R, Dout) f32
    """
    if activation not in _VALID_ACTIVATIONS:
        raise ValueError(f"Invalid activation: {activation}")
    R, Din = x.shape
    H = w1.shape[1]
    Dout = w2.shape[1]

    # Row tile: either the full row count (small inputs) or a multiple of 8.
    tile_r = min(tile_r, R)
    if tile_r != R and tile_r % 8 != 0:
        tile_r = max(8, (tile_r // 8) * 8)
    grid = (pl.cdiv(R, tile_r),)

    kernel = functools.partial(_regression_head_kernel, activation=activation)
    # TODO(synk): for very large Din/H add a K-axis grid with an f32 accumulator
    # scratch; typical regression-head sizes fit weights in VMEM comfortably.
    return pl.pallas_call(
        kernel,
        out_shape=jax.ShapeDtypeStruct((R, Dout), jnp.float32),
        grid_spec=pltpu.PrefetchScalarGridSpec(
            num_scalar_prefetch=0,
            grid=grid,
            in_specs=[
                pl.BlockSpec((tile_r, Din), lambda i: (i, 0)),   # x row tile (pipelined)
                pl.BlockSpec((Din, H), lambda i: (0, 0)),        # W1 (resident)
                pl.BlockSpec((1, H), lambda i: (0, 0)),          # b1 (resident)
                pl.BlockSpec((H, Dout), lambda i: (0, 0)),       # W2 (resident)
                pl.BlockSpec((1, Dout), lambda i: (0, 0)),       # b2 (resident)
            ],
            out_specs=pl.BlockSpec((tile_r, Dout), lambda i: (i, 0)),
        ),
        compiler_params=pltpu.CompilerParams(
            dimension_semantics=("parallel",),       # row tiles shard on v7x 2-TC
            vmem_limit_bytes=32 * 1024 * 1024,       # safe on v5e/v6e/v7x
        ),
    )(x.astype(jnp.float32), w1, b1, w2, b2)


# ----------------------------------------------------------------------------
# Module wrapper (parameter init + forward), mirroring the PyTorch module.
# ----------------------------------------------------------------------------
class RegressionHeadPallas:
    def __init__(self, in_channels, hidden_channels, out_channels,
                 output_activation=None, *, key=None):
        if output_activation not in _VALID_ACTIVATIONS:
            raise ValueError(f"Invalid activation: {output_activation}")
        if key is None:
            key = jax.random.PRNGKey(0)
        self.in_channels = in_channels
        self.hidden_channels = hidden_channels
        self.out_channels = out_channels
        self.output_activation = output_activation

        k1, k2 = jax.random.split(key)
        self.w1, self.b1 = self._linear_init(k1, in_channels, hidden_channels)
        self.w2, self.b2 = self._linear_init(k2, hidden_channels, out_channels)

    @staticmethod
    def _linear_init(key, in_size, out_size):
        # nn.Linear-style uniform init; weight stored as (in, out) so the
        # kernel computes x @ W  (== torch x @ W^T).
        kw, kb = jax.random.split(key)
        bound = 1.0 / jnp.sqrt(jnp.float32(in_size))
        w = jax.random.uniform(kw, (in_size, out_size), jnp.float32, -bound, bound)
        b = jax.random.uniform(kb, (1, out_size), jnp.float32, -bound, bound)
        return w, b

    def forward(self, x, *, tile_r=512):
        lead = x.shape[:-1]
        x2 = x.reshape(-1, x.shape[-1])
        y = regression_head_pallas(
            x2, self.w1, self.b1, self.w2, self.b2,
            activation=self.output_activation, tile_r=tile_r)
        return y.reshape(*lead, self.out_channels)

    __call__ = forward


# ----------------------------------------------------------------------------
# Pure-JAX reference for verification
# ----------------------------------------------------------------------------
def ref_forward(head, x):
    h = jnp.maximum(x @ head.w1 + head.b1[0], 0.0)
    y = h @ head.w2 + head.b2[0]
    act = head.output_activation
    if act == "relu":
        y = jnp.maximum(y, 0.0)
    elif act == "sigmoid":
        y = jax.nn.sigmoid(y)
    elif act == "tanh":
        y = jnp.tanh(y)
    return y


# ----------------------------------------------------------------------------
if __name__ == "__main__":
    key = jax.random.PRNGKey(0)
    kx, kh1, kh2, kh3 = jax.random.split(key, 4)

    # Small, module-consistent shapes: 64 rows, in=32, hidden=64, out=16.
    R, IN, HID, OUT = 64, 32, 64, 16
    x = jax.random.normal(kx, (R, IN), jnp.float32)

    # Config 1: no output activation (identity), single grid step.
    head1 = RegressionHeadPallas(IN, HID, OUT, output_activation=None, key=kh1)
    y1 = head1(x)
    jax.block_until_ready(y1)
    assert y1.shape == (R, OUT)
    assert jnp.allclose(y1, ref_forward(head1, x), atol=1e-5)

    # Config 2: tanh output activation, multiple grid steps (exercises pipeline).
    head2 = RegressionHeadPallas(IN, HID, OUT, output_activation="tanh", key=kh2)
    xl = jax.random.normal(kx, (128, IN), jnp.float32)
    y2 = head2(xl, tile_r=32)        # grid = (4,)
    jax.block_until_ready(y2)
    assert y2.shape == (128, OUT)
    assert jnp.allclose(y2, ref_forward(head2, xl), atol=1e-5)

    # Config 3: sigmoid output activation with a leading batch dim.
    head3 = RegressionHeadPallas(IN, HID, OUT, output_activation="sigmoid", key=kh3)
    xb = x.reshape(4, 16, IN)
    y3 = head3(xb)
    jax.block_until_ready(y3)
    assert y3.shape == (4, 16, OUT)
    assert jnp.allclose(y3.reshape(R, OUT), ref_forward(head3, x), atol=1e-5)

    print("KERNEL_OK")
</pallas_src>

<mosaic_0001>
module attributes {stable_mosaic.version = 11 : i64} {
  func.func @_regression_head_kernel(%arg0: i32, %arg1: memref<64x32xf32, #tpu.memory_space<vmem>>, %arg2: memref<32x64xf32, #tpu.memory_space<vmem>>, %arg3: memref<1x64xf32, #tpu.memory_space<vmem>>, %arg4: memref<64x16xf32, #tpu.memory_space<vmem>>, %arg5: memref<1x16xf32, #tpu.memory_space<vmem>>, %arg6: memref<64x16xf32, #tpu.memory_space<vmem>>) attributes {dimension_semantics = [#tpu.dimension_semantics<parallel>], iteration_bounds = array<i64: 1>, scalar_prefetch = 0 : i64, scratch_operands = 0 : i64, tpu.core_type = #tpu.core_type<tc>, window_params = [{transform_indices = @transform_0, window_bounds = array<i64: 64, 32>}, {pipeline_mode = #tpu.pipeline_mode<synchronous>, transform_indices = @transform_1, window_bounds = array<i64: 32, 64>}, {pipeline_mode = #tpu.pipeline_mode<synchronous>, transform_indices = @transform_2, window_bounds = array<i64: 1, 64>}, {pipeline_mode = #tpu.pipeline_mode<synchronous>, transform_indices = @transform_3, window_bounds = array<i64: 64, 16>}, {pipeline_mode = #tpu.pipeline_mode<synchronous>, transform_indices = @transform_4, window_bounds = array<i64: 1, 16>}, {transform_indices = @transform_5, window_bounds = array<i64: 64, 16>}]} {
    %c0 = arith.constant 0 : index
    %c0_0 = arith.constant 0 : index
    %0 = vector.load %arg1[%c0, %c0_0] : memref<64x32xf32, #tpu.memory_space<vmem>>, vector<64x32xf32>
    %c0_1 = arith.constant 0 : index
    %c0_2 = arith.constant 0 : index
    %1 = vector.load %arg2[%c0_1, %c0_2] : memref<32x64xf32, #tpu.memory_space<vmem>>, vector<32x64xf32>
    %cst = arith.constant dense<0.000000e+00> : vector<64x64xf32>
    %2 = tpu.matmul %0, %1, %cst {dimension_numbers = #tpu.dot_dimension_numbers<[1], [0], [0], [1], [0, 0, 1, 1], [], []>} : vector<64x32xf32>, vector<32x64xf32>, vector<64x64xf32> -> vector<64x64xf32>
    %c0_3 = arith.constant 0 : index
    %c0_4 = arith.constant 0 : index
    %3 = vector.load %arg3[%c0_3, %c0_4] : memref<1x64xf32, #tpu.memory_space<vmem>>, vector<1x64xf32>
    %4 = vector.broadcast %3 : vector<1x64xf32> to vector<64x64xf32>
    %5 = arith.addf %2, %4 : vector<64x64xf32>
    %cst_5 = arith.constant 0.000000e+00 : f32
    %6 = vector.broadcast %cst_5 : f32 to vector<64x64xf32>
    %7 = arith.maximumf %5, %6 : vector<64x64xf32>
    %c0_6 = arith.constant 0 : index
    %c0_7 = arith.constant 0 : index
    %8 = vector.load %arg4[%c0_6, %c0_7] : memref<64x16xf32, #tpu.memory_space<vmem>>, vector<64x16xf32>
    %cst_8 = arith.constant dense<0.000000e+00> : vector<64x16xf32>
    %9 = tpu.matmul %7, %8, %cst_8 {dimension_numbers = #tpu.dot_dimension_numbers<[1], [0], [0], [1], [0, 0, 1, 1], [], []>} : vector<64x64xf32>, vector<64x16xf32>, vector<64x16xf32> -> vector<64x16xf32>
    %c0_9 = arith.constant 0 : index
    %c0_10 = arith.constant 0 : index
    %10 = vector.load %arg5[%c0_9, %c0_10] : memref<1x16xf32, #tpu.memory_space<vmem>>, vector<1x16xf32>
    %11 = vector.broadcast %10 : vector<1x16xf32> to vector<64x16xf32>
    %12 = arith.addf %9, %11 : vector<64x16xf32>
    %c0_11 = arith.constant 0 : index
    %c0_12 = arith.constant 0 : index
    %13 = vector.load %arg6[%c0_11, %c0_12] : memref<64x16xf32, #tpu.memory_space<vmem>>, vector<64x16xf32>
    tpu.vector_store %arg6[%c0_11, %c0_12], %12 {strides = array<i32>} : memref<64x16xf32, #tpu.memory_space<vmem>>, vector<64x16xf32>,
    return
  }
  func.func @transform_0(%arg0: i32) -> (i32, i32) {
    %c0_i32 = arith.constant 0 : i32
    %c0_i32_0 = arith.constant 0 : i32
    return %arg0, %c0_i32 : i32, i32
  }
  func.func @transform_1(%arg0: i32) -> (i32, i32) {
    %c0_i32 = arith.constant 0 : i32
    %c0_i32_0 = arith.constant 0 : i32
    %c0_i32_1 = arith.constant 0 : i32
    return %c0_i32, %c0_i32_0 : i32, i32
  }
  func.func @transform_2(%arg0: i32) -> (i32, i32) {
    %c0_i32 = arith.constant 0 : i32
    %c0_i32_0 = arith.constant 0 : i32
    %c0_i32_1 = arith.constant 0 : i32
    return %c0_i32, %c0_i32_0 : i32, i32
  }
  func.func @transform_3(%arg0: i32) -> (i32, i32) {
    %c0_i32 = arith.constant 0 : i32
    %c0_i32_0 = arith.constant 0 : i32
    %c0_i32_1 = arith.constant 0 : i32
    return %c0_i32, %c0_i32_0 : i32, i32
  }
  func.func @transform_4(%arg0: i32) -> (i32, i32) {
    %c0_i32 = arith.constant 0 : i32
    %c0_i32_0 = arith.constant 0 : i32
    %c0_i32_1 = arith.constant 0 : i32
    return %c0_i32, %c0_i32_0 : i32, i32
  }
  func.func @transform_5(%arg0: i32) -> (i32, i32) {
    %c0_i32 = arith.constant 0 : i32
    %c0_i32_0 = arith.constant 0 : i32
    return %arg0, %c0_i32 : i32, i32
  }
}

</mosaic_0001>

<bundles_post_ra>
// kernel: tpu_custom_call.1
= control target key start
LH: loop header
LB: loop body
LE: loop exit
PB: predicated region body
PF: predicated region fallthrough
CT: control target
= control target key end

     0   :  { %vm39_vm0 = vcmask 261120   ;;  %vm192_vm1 = vcmask 523264   ;;  %vm322_vm2 = vcmask 130048   ;;  %s605_s1 = inlined_call_operand.vmem [shape: f32[32,64], index: 1, kind: input, shape index: {}]   ;;  %s606_s0 = inlined_call_operand.vmem [shape: f32[64,32], index: 0, kind: input, shape index: {}]   ;;  %s607_s3 = inlined_call_operand.vmem [shape: f32[64,16], index: 3, kind: input, shape index: {}]   ;;  %s608_s2 = inlined_call_operand.vmem [shape: f32[1,64], index: 2, kind: input, shape index: {}]   ;;  %s609_s4 = inlined_call_operand.vmem [shape: f32[1,16], index: 4, kind: input, shape index: {}]   ;;  %s610_s5 = inlined_call_operand.vmem [shape: f32[64,16], index: 5, kind: output, shape index: {}]  }
   0x1   :  { %v28_v0 = vld [vmem:[%s605_s1] sm:$0xff]  ;;  %v29_v1 = vld [vmem:[%s605_s1 + $0x8] sm:$0xff]  ;;  %v30_v2 = vld [vmem:[%s605_s1 + $0x10] sm:$0xff] }
   0x2   :  { %v429_v3 = vpack.c.bf16 %v29_v1, %v28_v0  ;;  %v31_v4 = vld [vmem:[%s605_s1 + $0x18] sm:$0xff]  ;;  %v20_v5 = vld [vmem:[%s606_s0] sm:$0xff]  ;;  %v178_v8 = vld [vmem:[%s607_s3 + $0x8] sm:$0xff] }
   0x3   :  { %v433_v6 = vpack.c.bf16 %v31_v4, %v30_v2  ;;  %389 = vmatprep.mubr.msk.f32.mxu0 %vm39_vm0, %v20_v5  ;;  %v177_v7 = vld [vmem:[%s607_s3] sm:$0xff]  ;;  %v179_v9 = vld [vmem:[%s607_s3 + $0x10] sm:$0xff]  ;;  %v180_v11 = vld [vmem:[%s607_s3 + $0x18] sm:$0xff] }
   0x4   :  { %430 = vmatprep.subr.bf16.mxu0 %v429_v3  ;;  %v437_v10 = vpack.c.bf16 %v178_v8, %v177_v7  ;;  %v441_v12 = vpack.c.bf16 %v180_v11, %v179_v9  ;;  %v21_v13 = vld [vmem:[%s606_s0 + $0x8] sm:$0xff]  ;;  %v22_v14 = vld [vmem:[%s606_s0 + $0x10] sm:$0xff]  ;;  %v181_v15 = vld [vmem:[%s607_s3 + $0x20] sm:$0xff] }
   0x5   :  { %432 = vmatpush3.bf16.msra.mxu0 %v429_v3  ;;  %v182_v16 = vld [vmem:[%s607_s3 + $0x28] sm:$0xff]  ;;  %v23_v17 = vld [vmem:[%s606_s0 + $0x18] sm:$0xff]  ;;  %v24_v19 = vld [vmem:[%s606_s0 + $0x20] sm:$0xff] }
   0x6   :  { %434 = vmatprep.subr.bf16.mxu0 %v433_v6  ;;  %453 = vmatprep.subr.bf16.mxu1 %v437_v10  ;;  %v445_v18 = vpack.c.bf16 %v182_v16, %v181_v15  ;;  %v25_v20 = vld [vmem:[%s606_s0 + $0x28] sm:$0xff]  ;;  %v26_v21 = vld [vmem:[%s606_s0 + $0x30] sm:$0xff]  ;;  %v27_v22 = vld [vmem:[%s606_s0 + $0x38] sm:$0xff] }
   0x7   :  { %457 = vmatpush3.bf16.msra.mxu1 %v437_v10  ;;  %v183_v23 = vld [vmem:[%s607_s3 + $0x30] sm:$0xff]  ;;  %v184_v24 = vld [vmem:[%s607_s3 + $0x38] sm:$0xff]  ;;  %v335_v26 = vld [vmem:[%s608_s2] ss:$0 sm:$0xff] }
   0x8   :  { %454 = vmatprep.subr.bf16.mxu1 %v441_v12  ;;  %v449_v25 = vpack.c.bf16 %v184_v24, %v183_v23  ;;  %v344_v51 = vld [vmem:[%s609_s4] ss:$0 sm:$0xff] }
   0x9   :  { %436 = vmatpush3.bf16.msra.mxu0 %v433_v6 }
   0xa   :  { %438 = vmatprep.subr.bf16.mxu0 %v437_v10 }
   0xb   :  { %458 = vmatpush3.bf16.msra.mxu1 %v441_v12 }
   0xc   :  { %390 = vmatmul.mubr.msk.f32.vlgmr.msra.gmra.mrb[0].mxu0 %vm39_vm0, %v21_v13  ;;  %455 = vmatprep.subr.bf16.mxu1 %v445_v18 }
   0xd   :  { %392 = vmatprep.mubr.msk.f32.mxu0 %vm39_vm0, %v22_v14  ;;  %440 = vmatpush3.bf16.msra.mxu0 %v437_v10 }
   0xe   :  { %442 = vmatprep.subr.bf16.mxu0 %v441_v12 }
   0xf   :  { %459 = vmatpush3.bf16.msra.mxu1 %v445_v18 }
  0x10   :  { %393 = vmatmul.mubr.msk.f32.gmra.mrb[2].mxu0 %vm39_vm0, %v23_v17  ;;  %456 = vmatprep.subr.bf16.mxu1 %v449_v25 }
  0x11   :  { %395 = vmatprep.mubr.msk.f32.mxu0 %vm39_vm0, %v24_v19  ;;  %444 = vmatpush3.bf16.msra.mxu0 %v441_v12 }
  0x12   :  { %446 = vmatprep.subr.bf16.mxu0 %v445_v18 }
  0x13   :  { %460 = vmatpush3.bf16.msra.mxu1 %v449_v25 }
  0x14   :  { %396 = vmatmul.mubr.msk.f32.gmra.mrb[4].mxu0 %vm39_vm0, %v25_v20 }
  0x15   :  { %398 = vmatprep.mubr.msk.f32.mxu0 %vm39_vm0, %v26_v21  ;;  %448 = vmatpush3.bf16.msra.mxu0 %v445_v18 }
  0x16   :  { %450 = vmatprep.subr.bf16.mxu0 %v449_v25 }
  0x18   :  { %399 = vmatmul.mubr.msk.f32.gmra.mrb[6].mxu0 %vm39_vm0, %v27_v22 }
  0x19   :  { %452 = vmatpush3.bf16.msra.mxu0 %v449_v25 }
  0xdf   :  { %v391_v27 = vpop.f32.mrb[0].mxu0 }
  0xe0   :  { %v136_v28 = vadd.f32 %v391_v27, %v335_v26  ;;  %v130_v29 = vpop.f32.mrb[1].mxu0 }
  0xe1   :  { %v131_v30 = vadd.f32 %v335_v26, %v130_v29 }
  0xe2   :  { %v170_v33 = vmax.f32 %v136_v28, 0.0 }
  0xe3   :  { %v169_v31 = vmax.f32 %v131_v30, 0.0  ;;  %v394_v32 = vpop.f32.mrb[2].mxu0 }
  0xe4   :  { %v146_v34 = vadd.f32 %v394_v32, %v335_v26  ;;  %v140_v35 = vpop.f32.mrb[3].mxu0 }
  0xe5   :  { %v141_v36 = vadd.f32 %v335_v26, %v140_v35  ;;  %417 = vmatprep.mubr.msk.f32.mxu0 %vm192_vm1, %v169_v31 }
  0xe6   :  { %418 = vmatmul.mubr.msk.f32.vlgmr.msra.gmra.mrb[8].mxu0 %vm192_vm1, %v170_v33  ;;  %v172_v39 = vmax.f32 %v146_v34, 0.0 }
  0xe7   :  { %v171_v37 = vmax.f32 %v141_v36, 0.0  ;;  %v397_v38 = vpop.f32.mrb[4].mxu0 }
  0xe8   :  { %v156_v40 = vadd.f32 %v397_v38, %v335_v26  ;;  %v150_v41 = vpop.f32.mrb[5].mxu0 }
  0xe9   :  { %v151_v42 = vadd.f32 %v335_v26, %v150_v41  ;;  %420 = vmatprep.mubr.msk.f32.mxu1 %vm192_vm1, %v171_v37 }
  0xea   :  { %421 = vmatmul.mubr.msk.f32.vlgmr.msra.gmra.mrb[0].mxu1 %vm192_vm1, %v172_v39  ;;  %v174_v45 = vmax.f32 %v156_v40, 0.0 }
  0xeb   :  { %v173_v43 = vmax.f32 %v151_v42, 0.0  ;;  %v400_v44 = vpop.f32.mrb[6].mxu0 }
  0xec   :  { %v166_v46 = vadd.f32 %v400_v44, %v335_v26  ;;  %v160_v47 = vpop.f32.mrb[7].mxu0 }
  0xed   :  { %v161_v48 = vadd.f32 %v335_v26, %v160_v47  ;;  %423 = vmatprep.mubr.msk.f32.mxu1 %vm192_vm1, %v173_v43 }
  0xee   :  { %424 = vmatmul.mubr.msk.f32.gmra.mrb[2].mxu1 %vm192_vm1, %v174_v45  ;;  %v176_v50 = vmax.f32 %v166_v46, 0.0 }
  0xef   :  { %v175_v49 = vmax.f32 %v161_v48, 0.0 }
  0xf1   :  { %426 = vmatprep.mubr.msk.f32.mxu1 %vm192_vm1, %v175_v49 }
  0xf2   :  { %427 = vmatmul.mubr.msk.f32.gmra.mrb[4].mxu1 %vm192_vm1, %v176_v50 }
 0x1b9   :  { %v419_v52 = vpop.f32.mrb[8].mxu0 }
 0x1ba   :  { %v289_v53 = vadd.f32 %v419_v52, %v344_v51  ;;  %v283_v54 = vpop.f32.mrb[9].mxu0 }
 0x1bb   :  { %v284_v55 = vadd.f32 %v344_v51, %v283_v54 }
 0x1bc   :  { %324 = vst.msk [vmem:[%s610_s5 + $0x8] sm:$0xff] %vm322_vm2, %v289_v53 }
 0x1bd   :  { %323 = vst.msk [vmem:[%s610_s5] sm:$0xff] %vm322_vm2, %v284_v55  ;;  %v422_v56 = vpop.f32.mrb[0].mxu1 }
 0x1be   :  { %v299_v57 = vadd.f32 %v422_v56, %v344_v51  ;;  %v293_v58 = vpop.f32.mrb[1].mxu1 }
 0x1bf   :  { %v294_v59 = vadd.f32 %v344_v51, %v293_v58 }
 0x1c0   :  { %326 = vst.msk [vmem:[%s610_s5 + $0x18] sm:$0xff] %vm322_vm2, %v299_v57 }
 0x1c1   :  { %325 = vst.msk [vmem:[%s610_s5 + $0x10] sm:$0xff] %vm322_vm2, %v294_v59  ;;  %v425_v60 = vpop.f32.mrb[2].mxu1 }
 0x1c2   :  { %v309_v61 = vadd.f32 %v425_v60, %v344_v51  ;;  %v303_v62 = vpop.f32.mrb[3].mxu1 }
 0x1c3   :  { %v304_v63 = vadd.f32 %v344_v51, %v303_v62 }
 0x1c4   :  { %328 = vst.msk [vmem:[%s610_s5 + $0x28] sm:$0xff] %vm322_vm2, %v309_v61 }
 0x1c5   :  { %327 = vst.msk [vmem:[%s610_s5 + $0x20] sm:$0xff] %vm322_vm2, %v304_v63  ;;  %v428_v0 = vpop.f32.mrb[4].mxu1 }
 0x1c6   :  { %v319_v1 = vadd.f32 %v428_v0, %v344_v51  ;;  %v313_v2 = vpop.f32.mrb[5].mxu1 }
 0x1c7   :  { %v314_v3 = vadd.f32 %v344_v51, %v313_v2 }
 0x1c8   :  { %330 = vst.msk [vmem:[%s610_s5 + $0x38] sm:$0xff] %vm322_vm2, %v319_v1 }
 0x1c9   :  { %329 = vst.msk [vmem:[%s610_s5 + $0x30] sm:$0xff] %vm322_vm2, %v314_v3 }

</bundles_post_ra>
